<compile_context>
chip_gen: v7x
topology: tpu7x:2x2x1
jax: 0.10.0
libtpu: 0.0.40
codegen_flags: <defaults>
</compile_context>

<pallas_src>
import functools

import jax
import jax.numpy as jnp
from jax import lax
from jax.experimental import pallas as pl
from jax.experimental.pallas import tpu as pltpu


def _leaky_relu(x, slope=0.2):
    return jnp.where(x >= 0, x, slope * x)


def _row_norm(h, scale, offset):
    # reference: mean/var over dim=1 (feature dim), unbiased=False, +1e-9 to var
    mean = jnp.mean(h, axis=1, keepdims=True)
    var = jnp.mean((h - mean) ** 2, axis=1, keepdims=True) + 1e-9
    return (h - mean) * scale * lax.rsqrt(var) + offset


def _pick_tile(n, want, align):
    """Largest tile t <= want with n % t == 0 and t % align == 0 (or t == n)."""
    if n <= want:
        return n
    t = (want // align) * align
    while t >= align:
        if n % t == 0:
            return t
        t -= align
    return n  # no aligned divisor: fall back to the full extent (block == dim)


# ---------------------------------------------------------------------------
# pass 1: fused feature transform + neighbor attention score (row-parallel)
# ---------------------------------------------------------------------------
def _transform_kernel(x_ref, w_ref, b_ref, att_neigh_ref, h0_ref, rhs_ref):
    dh = h0_ref.shape[1]
    # single wide MXU pass: ReLU(x @ [W0 | W1] + [b0 | b1])
    h = jnp.dot(x_ref[...], w_ref[...], preferred_element_type=jnp.float32)
    h = jnp.maximum(h + b_ref[...], 0.0)                       # (TR, 2*dh)
    h0 = h[:, :dh]
    h1 = h[:, dh:]
    a_neigh = _leaky_relu(jnp.sum(h1 * att_neigh_ref[...], axis=1, keepdims=True))
    h0_ref[...] = h0
    # slice stores instead of a lane-axis concatenate (avoids XLU relayout);
    # rhs is bf16 -- exact-enough given the f32 accumulator in pass 2.
    rhs_ref[:, :dh] = h1.astype(rhs_ref.dtype)
    rhs_ref[:, dh:] = (a_neigh * h1).astype(rhs_ref.dtype)


# ---------------------------------------------------------------------------
# pass 2: streamed mask aggregation + row-norm + order sum
#   grid = (row tiles [parallel], mask-column tiles [arbitrary, last])
# ---------------------------------------------------------------------------
def _aggregate_kernel(rhs_resident, mask_ref, rhs_ref, h0_ref, att_self_ref,
                      scale0_ref, off0_ref, scale1_ref, off1_ref,
                      out_ref, acc_ref):
    k = pl.program_id(1)

    @pl.when(k == 0)
    def _init():
        acc_ref[...] = jnp.zeros_like(acc_ref)

    tk = mask_ref.shape[1]
    if rhs_resident:
        # rhs lives fully in VMEM (DMA'd once per kernel); slice the k-th block.
        koff = pl.multiple_of(k * tk, tk)
        rhs_tile = rhs_ref[pl.ds(koff, tk), :]
    else:
        rhs_tile = rhs_ref[...]

    # in-kernel upcast of the 0/1 mask tile (int8/f32 -> bf16 is exact for 0/1);
    # one wide bf16 MXU pass covers both  mask @ h1  and  mask @ (a_neigh*h1).
    acc_ref[...] += jnp.dot(mask_ref[...].astype(jnp.bfloat16), rhs_tile,
                            preferred_element_type=jnp.float32)

    @pl.when(k == pl.num_programs(1) - 1)
    def _finalize():
        dh = h0_ref.shape[1]
        h0 = h0_ref[...]
        # recompute a_self from the resident h0 block (free VPU work; removes
        # a heavily lane-masked (N,1) DMA stream).
        a_self = _leaky_relu(jnp.sum(h0 * att_self_ref[...], axis=1, keepdims=True))
        agg = acc_ref[...]                                      # (TR, 2*dh)
        # att_adj @ h1 == a_self * (mask @ h1) + mask @ (a_neigh * h1)
        h1_agg = a_self * agg[:, :dh] + agg[:, dh:]
        out0 = _row_norm(h0, scale0_ref[...], off0_ref[...])
        out1 = _row_norm(h1_agg, scale1_ref[...], off1_ref[...])
        # aggr == 'mean' in the PyTorch reference sums the per-order outputs
        out_ref[...] = (out0 + out1).astype(out_ref.dtype)


def attention_aggregator_forward(adj_mask, feat_in, params, *,
                                 block_rows=512, block_cols=2048,
                                 block_rows_pass1=4096,
                                 rhs_resident_max_bytes=8 * 1024 * 1024):
    """Returns (adj_mask, feat_out) mirroring the PyTorch forward.

    adj_mask is streamed in its NATIVE dtype (pass int8/uint8 0/1 for minimum
    HBM traffic; f32 also works -- the cast to bf16 happens inside the kernel,
    never as a separate XLA pass over the N^2 array).
    """
    N, din = feat_in.shape
    dh = params["w0"].shape[1]

    # ---- tile selection ---------------------------------------------------
    # pass 1 per-tile work is tiny -> big row tiles to amortize ~0.35us/step.
    tr1 = _pick_tile(N, block_rows_pass1, 8)
    # pass 2: keep >= 2 row tiles when possible so the 'parallel' row axis can
    # split across v7x's two TensorCores; 32-row alignment keeps int8 tiling
    # (32,128) happy.  Column tiles are 128-lane aligned (or the full extent).
    want_rows = block_rows if N >= 2 * block_rows else max(N // 2, 32)
    tr = _pick_tile(N, want_rows, 32)
    tk = _pick_tile(N, block_cols, 128)
    # TODO(synk): no tail handling -- non-divisible N falls back to full-extent
    # blocks; real graph sizes should be padded by the caller.

    # fused transform weights: one MXU pass instead of two
    w_cat = jnp.concatenate([params["w0"], params["w1"]], axis=1)     # (Din, 2*dh)
    b_cat = jnp.concatenate([params["b0"], params["b1"]], axis=1)     # (1, 2*dh)

    # Within v7x's 64 MiB physical VMEM (review: stay <= ~48 MiB there); the
    # actual working set at the default tiles is only a few MiB.
    vmem_limit = 48 * 1024 * 1024

    # ---- pass 1: transform + a_neigh-scaled rhs ----------------------------
    h0, rhs = pl.pallas_call(
        _transform_kernel,
        out_shape=(
            jax.ShapeDtypeStruct((N, dh), jnp.float32),
            jax.ShapeDtypeStruct((N, 2 * dh), jnp.bfloat16),
        ),
        grid=(N // tr1,),
        in_specs=[
            pl.BlockSpec((tr1, din), lambda i: (i, 0)),
            pl.BlockSpec((din, 2 * dh), lambda i: (0, 0)),   # resident params
            pl.BlockSpec((1, 2 * dh), lambda i: (0, 0)),
            pl.BlockSpec((1, dh), lambda i: (0, 0)),
        ],
        out_specs=(
            pl.BlockSpec((tr1, dh), lambda i: (i, 0)),
            pl.BlockSpec((tr1, 2 * dh), lambda i: (i, 0)),
        ),
        compiler_params=pltpu.CompilerParams(
            dimension_semantics=("parallel",),
            vmem_limit_bytes=vmem_limit),
    )(feat_in, w_cat, b_cat, params["att_neigh"])

    # ---- pass 2: mask-streaming aggregation with k-reduction accumulator ---
    rhs_resident = (N * 2 * dh * 2) <= rhs_resident_max_bytes
    if rhs_resident:
        # constant index_map -> DMA'd once for the whole kernel (no re-stream)
        rhs_spec = pl.BlockSpec((N, 2 * dh), lambda i, k: (0, 0))
    else:
        rhs_spec = pl.BlockSpec((tk, 2 * dh), lambda i, k: (k, 0))

    feat_out = pl.pallas_call(
        functools.partial(_aggregate_kernel, rhs_resident),
        out_shape=jax.ShapeDtypeStruct((N, dh), jnp.float32),
        grid=(N // tr, N // tk),
        in_specs=[
            pl.BlockSpec((tr, tk), lambda i, k: (i, k)),       # streamed mask tile
            rhs_spec,                                          # aggregation RHS
            pl.BlockSpec((tr, dh), lambda i, k: (i, 0)),       # h0 row block
            pl.BlockSpec((1, dh), lambda i, k: (0, 0)),        # att_self (resident)
            pl.BlockSpec((1, dh), lambda i, k: (0, 0)),        # scale0
            pl.BlockSpec((1, dh), lambda i, k: (0, 0)),        # off0
            pl.BlockSpec((1, dh), lambda i, k: (0, 0)),        # scale1
            pl.BlockSpec((1, dh), lambda i, k: (0, 0)),        # off1
        ],
        out_specs=pl.BlockSpec((tr, dh), lambda i, k: (i, 0)),
        scratch_shapes=[pltpu.VMEM((tr, 2 * dh), jnp.float32)],
        compiler_params=pltpu.CompilerParams(
            dimension_semantics=("parallel", "arbitrary"),
            vmem_limit_bytes=vmem_limit),
    )(adj_mask, rhs, h0, params["att_self"],
      params["scale0"], params["off0"], params["scale1"], params["off1"])

    return adj_mask, feat_out


def _reference_jax(adj_mask_f32, feat_in, params):
    """Pure-JAX f32 reference mirroring the PyTorch module."""
    h0 = jnp.maximum(feat_in @ params["w0"] + params["b0"], 0.0)
    h1 = jnp.maximum(feat_in @ params["w1"] + params["b1"], 0.0)
    a_self = _leaky_relu(jnp.sum(h0 * params["att_self"], axis=1))    # (N,)
    a_neigh = _leaky_relu(jnp.sum(h1 * params["att_neigh"], axis=1))  # (N,)
    att_adj = adj_mask_f32 * (a_self[:, None] + a_neigh[None, :])
    h1_agg = att_adj @ h1
    out0 = _row_norm(h0, params["scale0"], params["off0"])
    out1 = _row_norm(h1_agg, params["scale1"], params["off1"])
    return out0 + out1


def _init_params(key, dim_in, dim_out, mulhead=1):
    dh = dim_out // mulhead
    k = jax.random.split(key, 6)
    # xavier_uniform for linear weights (PyTorch weight is (dh, dim_in); store W^T)
    bw = (6.0 / (dim_in + dh)) ** 0.5
    w0 = jax.random.uniform(k[0], (dim_in, dh), jnp.float32, -bw, bw)
    w1 = jax.random.uniform(k[1], (dim_in, dh), jnp.float32, -bw, bw)
    bb = 1.0 / (dim_in ** 0.5)
    b0 = jax.random.uniform(k[2], (1, dh), jnp.float32, -bb, bb)
    b1 = jax.random.uniform(k[3], (1, dh), jnp.float32, -bb, bb)
    # xavier_uniform for attention parameter of shape (1, 2*dh); split halves
    ba = (6.0 / (1 + 2 * dh)) ** 0.5
    att = jax.random.uniform(k[4], (1, 2 * dh), jnp.float32, -ba, ba)
    return {
        "w0": w0, "b0": b0, "w1": w1, "b1": b1,
        "att_self": att[:, :dh], "att_neigh": att[:, dh:],
        "scale0": jnp.ones((1, dh), jnp.float32), "off0": jnp.zeros((1, dh), jnp.float32),
        "scale1": jnp.ones((1, dh), jnp.float32), "off1": jnp.zeros((1, dh), jnp.float32),
    }


if __name__ == "__main__":
    key = jax.random.PRNGKey(0)
    N, dim_in, dim_out = 256, 64, 64

    kf, ka, kp = jax.random.split(key, 3)
    feat_in = jax.random.normal(kf, (N, dim_in), jnp.float32)
    # random sparse-ish adjacency as an int8 0/1 edge indicator (+ self loops);
    # the reference module discards sparse values and uses only the indices, so
    # an indicator mask reproduces the semantics exactly, and int8 streams the
    # dominant N^2 array at 1 byte/edge.
    adj01 = jax.random.uniform(ka, (N, N)) < 0.1
    adj01 = jnp.logical_or(adj01, jnp.eye(N, dtype=bool))
    adj_mask = adj01.astype(jnp.int8)

    params = _init_params(kp, dim_in, dim_out)

    # TODO(synk): dropout with p>0 (stateful RNG) is omitted; p=0.0 default => identity.
    # tile sizes chosen so the test exercises a real (2, 2) pass-2 grid
    _, feat_out = attention_aggregator_forward(
        adj_mask, feat_in, params, block_rows=128, block_cols=128)
    feat_out = jax.block_until_ready(feat_out)

    ref = _reference_jax(adj_mask.astype(jnp.float32), feat_in, params)
    assert feat_out.shape == (N, dim_out)
    # rhs goes through the MXU in bf16 (f32 accumulation), so compare against
    # the pure-f32 reference with a bf16-appropriate tolerance.
    max_err = float(jnp.max(jnp.abs(feat_out - ref)))
    assert jnp.allclose(feat_out, ref, atol=5e-2, rtol=5e-2), \
        f"mismatch vs JAX reference (max abs err {max_err})"

    print("KERNEL_OK")
</pallas_src>

<mosaic_0001>
module attributes {stable_mosaic.version = 11 : i64} {
  func.func @_transform_kernel(%arg0: i32, %arg1: memref<256x64xf32, #tpu.memory_space<vmem>>, %arg2: memref<64x128xf32, #tpu.memory_space<vmem>>, %arg3: memref<1x128xf32, #tpu.memory_space<vmem>>, %arg4: memref<1x64xf32, #tpu.memory_space<vmem>>, %arg5: memref<256x64xf32, #tpu.memory_space<vmem>>, %arg6: memref<256x128xbf16, #tpu.memory_space<vmem>>) attributes {dimension_semantics = [#tpu.dimension_semantics<parallel>], iteration_bounds = array<i64: 1>, scalar_prefetch = 0 : i64, scratch_operands = 0 : i64, tpu.core_type = #tpu.core_type<tc>, window_params = [{transform_indices = @transform_0, window_bounds = array<i64: 256, 64>}, {pipeline_mode = #tpu.pipeline_mode<synchronous>, transform_indices = @transform_1, window_bounds = array<i64: 64, 128>}, {pipeline_mode = #tpu.pipeline_mode<synchronous>, transform_indices = @transform_2, window_bounds = array<i64: 1, 128>}, {pipeline_mode = #tpu.pipeline_mode<synchronous>, transform_indices = @transform_3, window_bounds = array<i64: 1, 64>}, {transform_indices = @transform_4, window_bounds = array<i64: 256, 64>}, {transform_indices = @transform_5, window_bounds = array<i64: 256, 128>}]} {
    %c0 = arith.constant 0 : index
    %c0_0 = arith.constant 0 : index
    %0 = vector.load %arg1[%c0, %c0_0] : memref<256x64xf32, #tpu.memory_space<vmem>>, vector<256x64xf32>
    %c0_1 = arith.constant 0 : index
    %c0_2 = arith.constant 0 : index
    %1 = vector.load %arg2[%c0_1, %c0_2] : memref<64x128xf32, #tpu.memory_space<vmem>>, vector<64x128xf32>
    %cst = arith.constant dense<0.000000e+00> : vector<256x128xf32>
    %2 = tpu.matmul %0, %1, %cst {dimension_numbers = #tpu.dot_dimension_numbers<[1], [0], [0], [1], [0, 0, 1, 1], [], []>} : vector<256x64xf32>, vector<64x128xf32>, vector<256x128xf32> -> vector<256x128xf32>
    %c0_3 = arith.constant 0 : index
    %c0_4 = arith.constant 0 : index
    %3 = vector.load %arg3[%c0_3, %c0_4] : memref<1x128xf32, #tpu.memory_space<vmem>>, vector<1x128xf32>
    %4 = vector.broadcast %3 : vector<1x128xf32> to vector<256x128xf32>
    %5 = arith.addf %2, %4 : vector<256x128xf32>
    %cst_5 = arith.constant 0.000000e+00 : f32
    %6 = vector.broadcast %cst_5 : f32 to vector<256x128xf32>
    %7 = arith.maximumf %5, %6 : vector<256x128xf32>
    %8 = vector.extract_strided_slice %7 {offsets = [0, 0], sizes = [256, 64], strides = [1, 1]} : vector<256x128xf32> to vector<256x64xf32>
    %9 = vector.extract_strided_slice %7 {offsets = [0, 64], sizes = [256, 64], strides = [1, 1]} : vector<256x128xf32> to vector<256x64xf32>
    %c0_6 = arith.constant 0 : index
    %c0_7 = arith.constant 0 : index
    %10 = vector.load %arg4[%c0_6, %c0_7] : memref<1x64xf32, #tpu.memory_space<vmem>>, vector<1x64xf32>
    %11 = vector.broadcast %10 : vector<1x64xf32> to vector<256x64xf32>
    %12 = arith.mulf %9, %11 : vector<256x64xf32>
    %cst_8 = arith.constant dense<0.000000e+00> : vector<256xf32>
    %13 = vector.multi_reduction <add>, %12, %cst_8 [1] : vector<256x64xf32> to vector<256xf32>
    %14 = vector.shape_cast %13 : vector<256xf32> to vector<256x1xf32>
    %cst_9 = arith.constant 0.000000e+00 : f32
    %15 = vector.broadcast %cst_9 : f32 to vector<256x1xf32>
    %16 = arith.cmpf oge, %14, %15 : vector<256x1xf32>
    %cst_10 = arith.constant 2.000000e-01 : f32
    %17 = vector.broadcast %cst_10 : f32 to vector<256x1xf32>
    %18 = arith.mulf %17, %14 : vector<256x1xf32>
    %19 = arith.select %16, %14, %18 : vector<256x1xi1>, vector<256x1xf32>
    %c0_11 = arith.constant 0 : index
    %c0_12 = arith.constant 0 : index
    %20 = vector.load %arg5[%c0_11, %c0_12] : memref<256x64xf32, #tpu.memory_space<vmem>>, vector<256x64xf32>
    tpu.vector_store %arg5[%c0_11, %c0_12], %8 {strides = array<i32>} : memref<256x64xf32, #tpu.memory_space<vmem>>, vector<256x64xf32>,
    %21 = arith.truncf %9 : vector<256x64xf32> to vector<256x64xbf16>
    %c0_13 = arith.constant 0 : index
    %c0_14 = arith.constant 0 : index
    %22 = vector.load %arg6[%c0_13, %c0_14] : memref<256x128xbf16, #tpu.memory_space<vmem>>, vector<256x64xbf16>
    tpu.vector_store %arg6[%c0_13, %c0_14], %21 {strides = array<i32>} : memref<256x128xbf16, #tpu.memory_space<vmem>>, vector<256x64xbf16>,
    %23 = vector.broadcast %19 : vector<256x1xf32> to vector<256x64xf32>
    %24 = arith.mulf %23, %9 : vector<256x64xf32>
    %25 = arith.truncf %24 : vector<256x64xf32> to vector<256x64xbf16>
    %c0_15 = arith.constant 0 : index
    %c64 = arith.constant 64 : index
    %26 = vector.load %arg6[%c0_15, %c64] : memref<256x128xbf16, #tpu.memory_space<vmem>>, vector<256x64xbf16>
    tpu.vector_store %arg6[%c0_15, %c64], %25 {strides = array<i32>} : memref<256x128xbf16, #tpu.memory_space<vmem>>, vector<256x64xbf16>,
    return
  }
  func.func @transform_0(%arg0: i32) -> (i32, i32) {
    %c0_i32 = arith.constant 0 : i32
    %c0_i32_0 = arith.constant 0 : i32
    return %arg0, %c0_i32 : i32, i32
  }
  func.func @transform_1(%arg0: i32) -> (i32, i32) {
    %c0_i32 = arith.constant 0 : i32
    %c0_i32_0 = arith.constant 0 : i32
    %c0_i32_1 = arith.constant 0 : i32
    return %c0_i32, %c0_i32_0 : i32, i32
  }
  func.func @transform_2(%arg0: i32) -> (i32, i32) {
    %c0_i32 = arith.constant 0 : i32
    %c0_i32_0 = arith.constant 0 : i32
    %c0_i32_1 = arith.constant 0 : i32
    return %c0_i32, %c0_i32_0 : i32, i32
  }
  func.func @transform_3(%arg0: i32) -> (i32, i32) {
    %c0_i32 = arith.constant 0 : i32
    %c0_i32_0 = arith.constant 0 : i32
    %c0_i32_1 = arith.constant 0 : i32
    return %c0_i32, %c0_i32_0 : i32, i32
  }
  func.func @transform_4(%arg0: i32) -> (i32, i32) {
    %c0_i32 = arith.constant 0 : i32
    %c0_i32_0 = arith.constant 0 : i32
    return %arg0, %c0_i32 : i32, i32
  }
  func.func @transform_5(%arg0: i32) -> (i32, i32) {
    %c0_i32 = arith.constant 0 : i32
    %c0_i32_0 = arith.constant 0 : i32
    return %arg0, %c0_i32 : i32, i32
  }
}

</mosaic_0001>

<bundles_post_ra>
// kernel: tpu_custom_call.1
= control target key start
LH: loop header
LB: loop body
LE: loop exit
PB: predicated region body
PF: predicated region fallthrough
CT: control target
= control target key end

     0   :  { %vm67_vm0 = vcmask 523264   ;;  %s2355_s0 = inlined_call_operand.vmem [shape: f32[256,64], index: 0, kind: input, shape index: {}]   ;;  %s2356_s1 = inlined_call_operand.vmem [shape: f32[64,128], index: 1, kind: input, shape index: {}]   ;;  %s2357_s2 = inlined_call_operand.vmem [shape: f32[1,128], index: 2, kind: input, shape index: {}]   ;;  %s2358_s3 = inlined_call_operand.vmem [shape: f32[1,64], index: 3, kind: input, shape index: {}]   ;;  %s2359_s4 = inlined_call_operand.vmem [shape: f32[256,64], index: 4, kind: output, shape index: {0}]   ;;  %s2360_s5 = inlined_call_operand.hbm [shape: bf16[256,128], index: 5, kind: output, shape index: {1}]  }
   0x1   :  { %v52_v0 = vld [vmem:[%s2356_s1] sm:$0xff]  ;;  %v53_v1 = vld [vmem:[%s2356_s1 + $0x8] sm:$0xff]  ;;  %v54_v2 = vld [vmem:[%s2356_s1 + $0x10] sm:$0xff] }
   0x2   :  { %v1518_v3 = vpack.c.bf16 %v53_v1, %v52_v0  ;;  %v55_v4 = vld [vmem:[%s2356_s1 + $0x18] sm:$0xff]  ;;  %v56_v6 = vld [vmem:[%s2356_s1 + $0x20] sm:$0xff]  ;;  %v57_v7 = vld [vmem:[%s2356_s1 + $0x28] sm:$0xff] }
   0x3   :  { %v1522_v5 = vpack.c.bf16 %v55_v4, %v54_v2  ;;  %v20_v8 = vld [vmem:[%s2355_s0] sm:$0xff]  ;;  %v1526_v10 = vpack.c.bf16 %v57_v7, %v56_v6  ;;  %v58_v11 = vld [vmem:[%s2356_s1 + $0x30] sm:$0xff]  ;;  %v59_v12 = vld [vmem:[%s2356_s1 + $0x38] sm:$0xff] }
   0x4   :  { %1519 = vmatprep.subr.bf16.mxu0 %v1518_v3  ;;  %1534 = vmatprep.subr.bf16.mxu1 %v1518_v3  ;;  %v36_v9 = vld [vmem:[%s2355_s0 + $0x80] sm:$0xff]  ;;  %v1530_v13 = vpack.c.bf16 %v59_v12, %v58_v11 }
   0x5   :  { %1521 = vmatpush3.bf16.msra.mxu0 %v1518_v3  ;;  %1538 = vmatpush3.bf16.msra.mxu1 %v1518_v3  ;;  %v1285_v14 = vld [vmem:[%s2358_s3] ss:$0 sm:$0xff] }
   0x6   :  { %1523 = vmatprep.subr.bf16.mxu0 %v1522_v5  ;;  %1535 = vmatprep.subr.bf16.mxu1 %v1522_v5 }
   0x7   :  { %1470 = vmatprep.mubr.msk.f32.mxu0 %vm67_vm0, %v20_v8  ;;  %1494 = vmatprep.mubr.msk.f32.mxu1 %vm67_vm0, %v36_v9 }
   0x9   :  { %1525 = vmatpush3.bf16.msra.mxu0 %v1522_v5  ;;  %1539 = vmatpush3.bf16.msra.mxu1 %v1522_v5 }
   0xa   :  { %1527 = vmatprep.subr.bf16.mxu0 %v1526_v10  ;;  %1536 = vmatprep.subr.bf16.mxu1 %v1526_v10 }
   0xd   :  { %1529 = vmatpush3.bf16.msra.mxu0 %v1526_v10  ;;  %1540 = vmatpush3.bf16.msra.mxu1 %v1526_v10 }
   0xe   :  { %1531 = vmatprep.subr.bf16.mxu0 %v1530_v13  ;;  %1537 = vmatprep.subr.bf16.mxu1 %v1530_v13 }
   0xf   :  { %11 = vsyncpa [#allocation3], 0  ;;  %s1569_s15 = smov 64   ;;  %v21_v15 = vld [vmem:[%s2355_s0 + $0x8] sm:$0xff]  ;;  %v22_v17 = vld [vmem:[%s2355_s0 + $0x10] sm:$0xff]  ;;  %vm1006_vm1 = vcmask 519168  }
  0x10   :  { %427 = vrot.lane.b32.xlu0 %v1285_v14, %s1569_s15  ;;  %v37_v16 = vld [vmem:[%s2355_s0 + $0x88] sm:$0xff]  ;;  %v38_v18 = vld [vmem:[%s2355_s0 + $0x90] sm:$0xff]  ;;  %v23_v19 = vld [vmem:[%s2355_s0 + $0x18] sm:$0xff]  ;;  %vm1199_vm3 = vcmask 1043968  }
  0x11   :  { %1533 = vmatpush3.bf16.msra.mxu0 %v1530_v13  ;;  %1541 = vmatpush3.bf16.msra.mxu1 %v1530_v13  ;;  %v39_v20 = vld [vmem:[%s2355_s0 + $0x98] sm:$0xff]  ;;  %v24_v21 = vld [vmem:[%s2355_s0 + $0x20] sm:$0xff]  ;;  %v25_v23 = vld [vmem:[%s2355_s0 + $0x28] sm:$0xff] }
  0x12   :  { %v40_v22 = vld [vmem:[%s2355_s0 + $0xa0] sm:$0xff]  ;;  %v41_v24 = vld [vmem:[%s2355_s0 + $0xa8] sm:$0xff]  ;;  %v26_v25 = vld [vmem:[%s2355_s0 + $0x30] sm:$0xff] }
  0x13   :  { %v42_v26 = vld [vmem:[%s2355_s0 + $0xb0] sm:$0xff]  ;;  %v27_v27 = vld [vmem:[%s2355_s0 + $0x38] sm:$0xff]  ;;  %v28_v29 = vld [vmem:[%s2355_s0 + $0x40] sm:$0xff] }
  0x14   :  { %1471 = vmatmul.mubr.msk.f32.vlgmr.msra.gmra.mrb[0].mxu0 %vm67_vm0, %v21_v15  ;;  %1495 = vmatmul.mubr.msk.f32.vlgmr.msra.gmra.mrb[0].mxu1 %vm67_vm0, %v37_v16  ;;  %v43_v28 = vld [vmem:[%s2355_s0 + $0xb8] sm:$0xff]  ;;  %v44_v30 = vld [vmem:[%s2355_s0 + $0xc0] sm:$0xff]  ;;  %v29_v31 = vld [vmem:[%s2355_s0 + $0x48] sm:$0xff] }
  0x15   :  { %1473 = vmatprep.mubr.msk.f32.mxu0 %vm67_vm0, %v22_v17  ;;  %1497 = vmatprep.mubr.msk.f32.mxu1 %vm67_vm0, %v38_v18  ;;  %v45_v32 = vld [vmem:[%s2355_s0 + $0xc8] sm:$0xff]  ;;  %v30_v33 = vld [vmem:[%s2355_s0 + $0x50] sm:$0xff]  ;;  %v31_v35 = vld [vmem:[%s2355_s0 + $0x58] sm:$0xff] }
  0x16   :  { %v46_v34 = vld [vmem:[%s2355_s0 + $0xd0] sm:$0xff]  ;;  %v47_v36 = vld [vmem:[%s2355_s0 + $0xd8] sm:$0xff]  ;;  %v32_v37 = vld [vmem:[%s2355_s0 + $0x60] sm:$0xff] }
  0x17   :  { %v48_v38 = vld [vmem:[%s2355_s0 + $0xe0] sm:$0xff]  ;;  %v33_v39 = vld [vmem:[%s2355_s0 + $0x68] sm:$0xff]  ;;  %v34_v41 = vld [vmem:[%s2355_s0 + $0x70] sm:$0xff] }
  0x18   :  { %1474 = vmatmul.mubr.msk.f32.gmra.mrb[2].mxu0 %vm67_vm0, %v23_v19  ;;  %1498 = vmatmul.mubr.msk.f32.gmra.mrb[2].mxu1 %vm67_vm0, %v39_v20  ;;  %v49_v40 = vld [vmem:[%s2355_s0 + $0xe8] sm:$0xff]  ;;  %v50_v42 = vld [vmem:[%s2355_s0 + $0xf0] sm:$0xff]  ;;  %v35_v43 = vld [vmem:[%s2355_s0 + $0x78] sm:$0xff] }
  0x19   :  { %1476 = vmatprep.mubr.msk.f32.mxu0 %vm67_vm0, %v24_v21  ;;  %1500 = vmatprep.mubr.msk.f32.mxu1 %vm67_vm0, %v40_v22  ;;  %v51_v44 = vld [vmem:[%s2355_s0 + $0xf8] sm:$0xff]  ;;  %v1761_v45 = vld [vmem:[%s2357_s2] ss:$0 sm:$0xff] }
  0x1c   :  { %1477 = vmatmul.mubr.msk.f32.gmra.mrb[4].mxu0 %vm67_vm0, %v25_v23  ;;  %1501 = vmatmul.mubr.msk.f32.gmra.mrb[4].mxu1 %vm67_vm0, %v41_v24 }
  0x1d   :  { %1479 = vmatprep.mubr.msk.f32.mxu0 %vm67_vm0, %v26_v25  ;;  %1503 = vmatprep.mubr.msk.f32.mxu1 %vm67_vm0, %v42_v26 }
  0x20   :  { %1480 = vmatmul.mubr.msk.f32.gmra.mrb[6].mxu0 %vm67_vm0, %v27_v27  ;;  %1504 = vmatmul.mubr.msk.f32.gmra.mrb[6].mxu1 %vm67_vm0, %v43_v28 }
  0x21   :  { %1482 = vmatprep.mubr.msk.f32.mxu0 %vm67_vm0, %v28_v29  ;;  %1506 = vmatprep.mubr.msk.f32.mxu1 %vm67_vm0, %v44_v30 }
  0x24   :  { %1483 = vmatmul.mubr.msk.f32.gmra.mrb[8].mxu0 %vm67_vm0, %v29_v31  ;;  %1507 = vmatmul.mubr.msk.f32.gmra.mrb[8].mxu1 %vm67_vm0, %v45_v32 }
  0x25   :  { %1485 = vmatprep.mubr.msk.f32.mxu0 %vm67_vm0, %v30_v33  ;;  %1509 = vmatprep.mubr.msk.f32.mxu1 %vm67_vm0, %v46_v34 }
  0x28   :  { %1486 = vmatmul.mubr.msk.f32.gmra.mrb[10].mxu0 %vm67_vm0, %v31_v35  ;;  %1510 = vmatmul.mubr.msk.f32.gmra.mrb[10].mxu1 %vm67_vm0, %v47_v36 }
  0x29   :  { %1488 = vmatprep.mubr.msk.f32.mxu0 %vm67_vm0, %v32_v37  ;;  %1512 = vmatprep.mubr.msk.f32.mxu1 %vm67_vm0, %v48_v38 }
  0x2c   :  { %1489 = vmatmul.mubr.msk.f32.gmra.mrb[12].mxu0 %vm67_vm0, %v33_v39  ;;  %1513 = vmatmul.mubr.msk.f32.gmra.mrb[12].mxu1 %vm67_vm0, %v49_v40 }
  0x2d   :  { %1491 = vmatprep.mubr.msk.f32.mxu0 %vm67_vm0, %v34_v41  ;;  %1515 = vmatprep.mubr.msk.f32.mxu1 %vm67_vm0, %v50_v42 }
  0x30   :  { %1492 = vmatmul.mubr.msk.f32.gmra.mrb[14].mxu0 %vm67_vm0, %v35_v43  ;;  %1516 = vmatmul.mubr.msk.f32.gmra.mrb[14].mxu1 %vm67_vm0, %v51_v44 }
  0x82   :  { %v1767_v54 = vpop.permute.xlu0 %427 }
  0xe7   :  { %v1472_v46 = vpop.f32.mrb[0].mxu0  ;;  %v1496_v47 = vpop.f32.mrb[0].mxu1 }
  0xe8   :  { %v236_v48 = vadd.f32 %v1472_v46, %v1761_v45  ;;  %v316_v49 = vadd.f32 %v1496_v47, %v1761_v45  ;;  %v230_v50 = vpop.f32.mrb[1].mxu0  ;;  %v310_v51 = vpop.f32.mrb[1].mxu1 }
  0xe9   :  { %v231_v52 = vadd.f32 %v1761_v45, %v230_v50  ;;  %v311_v53 = vadd.f32 %v1761_v45, %v310_v51 }
  0xea   :  { %v1769_v55 = vmax.f32 %v236_v48, 0.0  ;;  %v1771_v56 = vmax.f32 %v316_v49, 0.0 }
  0xeb   :  { %v1773_v57 = vmax.f32 %v231_v52, 0.0  ;;  %v1775_v58 = vmax.f32 %v311_v53, 0.0  ;;  %v1475_v59 = vpop.f32.mrb[2].mxu0  ;;  %v1499_v60 = vpop.f32.mrb[2].mxu1 }
  0xec   :  { %783 = vst.msk [vmem:[%s2359_s4 + $0x8] sm:$0xff] %vm67_vm0, %v1769_v55  ;;  %799 = vst.msk [vmem:[%s2359_s4 + $0x88] sm:$0xff] %vm67_vm0, %v1771_v56  ;;  %v246_v61 = vadd.f32 %v1475_v59, %v1761_v45  ;;  %v326_v62 = vadd.f32 %v1499_v60, %v1761_v45  ;;  %v240_v63 = vpop.f32.mrb[3].mxu0  ;;  %v320_v0 = vpop.f32.mrb[3].mxu1  ;;  %v447_v1 = vmul.f32 %v1767_v54, %v1771_v56 }
  0xed   :  { %v431_v2 = vmul.f32 %v1767_v54, %v1769_v55  ;;  %782 = vst.msk [vmem:[%s2359_s4] sm:$0xff] %vm67_vm0, %v1773_v57  ;;  %798 = vst.msk [vmem:[%s2359_s4 + $0x80] sm:$0xff] %vm67_vm0, %v1775_v58  ;;  %v241_v3 = vadd.f32 %v1761_v45, %v240_v63  ;;  %v321_v4 = vadd.f32 %v1761_v45, %v320_v0 }
  0xee   :  { %v1805_v5 = vmax.f32 %v246_v61, 0.0  ;;  %v1807_v6 = vmax.f32 %v326_v62, 0.0  ;;  %528 = vrot.lane.b32.xlu0 %v447_v1, %s1569_s15  ;;  %v1367_v15 = vpack.c.bf16 %v1771_v56, %v1771_v56  ;;  %v1351_v16 = vpack.c.bf16 %v1769_v55, %v1769_v55 }
  0xef   :  { %496 = vrot.lane.b32.xlu1 %v431_v2, %s1569_s15  ;;  %v1811_v7 = vmax.f32 %v241_v3, 0.0  ;;  %v1813_v8 = vmax.f32 %v321_v4, 0.0  ;;  %v1478_v9 = vpop.f32.mrb[4].mxu0  ;;  %v1502_v10 = vpop.f32.mrb[4].mxu1  ;;  %v446_v29 = vmul.f32 %v1767_v54, %v1775_v58  ;;  %v430_v30 = vmul.f32 %v1767_v54, %v1773_v57 }
  0xf0   :  { %785 = vst.msk [vmem:[%s2359_s4 + $0x18] sm:$0xff] %vm67_vm0, %v1805_v5  ;;  %801 = vst.msk [vmem:[%s2359_s4 + $0x98] sm:$0xff] %vm67_vm0, %v1807_v6  ;;  %v256_v11 = vadd.f32 %v1478_v9, %v1761_v45  ;;  %v336_v12 = vadd.f32 %v1502_v10, %v1761_v45  ;;  %v250_v13 = vpop.f32.mrb[5].mxu0  ;;  %v330_v14 = vpop.f32.mrb[5].mxu1  ;;  %v1366_v43 = vpack.c.bf16 %v1775_v58, %v1775_v58 }
  0xf1   :  { %784 = vst.msk [vmem:[%s2359_s4 + $0x10] sm:$0xff] %vm67_vm0, %v1811_v7  ;;  %800 = vst.msk [vmem:[%s2359_s4 + $0x90] sm:$0xff] %vm67_vm0, %v1813_v8  ;;  %v251_v17 = vadd.f32 %v1761_v45, %v250_v13  ;;  %v331_v18 = vadd.f32 %v1761_v45, %v330_v14  ;;  %v1350_v44 = vpack.c.bf16 %v1773_v57, %v1773_v57 }
  0xf2   :  { %v1843_v19 = vmax.f32 %v256_v11, 0.0  ;;  %v1845_v20 = vmax.f32 %v336_v12, 0.0  ;;  %944 = vrot.lane.b32.xlu0 %v1367_v15, %s1569_s15  ;;  %v432_v63 = vmul.f32 %v1767_v54, %v1811_v7  ;;  %v433_v0 = vmul.f32 %v1767_v54, %v1805_v5 }
  0xf3   :  { %912 = vrot.lane.b32.xlu1 %v1351_v16, %s1569_s15  ;;  %v1849_v21 = vmax.f32 %v251_v17, 0.0  ;;  %v1851_v22 = vmax.f32 %v331_v18, 0.0  ;;  %v1481_v23 = vpop.f32.mrb[6].mxu0  ;;  %v1505_v24 = vpop.f32.mrb[6].mxu1  ;;  %v448_v17 = vmul.f32 %v1767_v54, %v1813_v8  ;;  %v449_v18 = vmul.f32 %v1767_v54, %v1807_v6 }
  0xf4   :  { %787 = vst.msk [vmem:[%s2359_s4 + $0x28] sm:$0xff] %vm67_vm0, %v1843_v19  ;;  %803 = vst.msk [vmem:[%s2359_s4 + $0xa8] sm:$0xff] %vm67_vm0, %v1845_v20  ;;  %v266_v25 = vadd.f32 %v1481_v23, %v1761_v45  ;;  %v346_v26 = vadd.f32 %v1505_v24, %v1761_v45  ;;  %v260_v27 = vpop.f32.mrb[7].mxu0  ;;  %v340_v28 = vpop.f32.mrb[7].mxu1 }
  0xf5   :  { %786 = vst.msk [vmem:[%s2359_s4 + $0x20] sm:$0xff] %vm67_vm0, %v1849_v21  ;;  %802 = vst.msk [vmem:[%s2359_s4 + $0xa0] sm:$0xff] %vm67_vm0, %v1851_v22  ;;  %v261_v31 = vadd.f32 %v1761_v45, %v260_v27  ;;  %v341_v32 = vadd.f32 %v1761_v45, %v340_v28 }
  0xf6   :  { %v1881_v33 = vmax.f32 %v266_v25, 0.0  ;;  %v1883_v34 = vmax.f32 %v346_v26, 0.0  ;;  %494 = vrot.lane.b32.xlu0 %v430_v30, %s1569_s15 }
  0xf7   :  { %526 = vrot.lane.b32.xlu1 %v446_v29, %s1569_s15  ;;  %v1887_v35 = vmax.f32 %v261_v31, 0.0  ;;  %v1889_v36 = vmax.f32 %v341_v32, 0.0  ;;  %v1484_v37 = vpop.f32.mrb[8].mxu0  ;;  %v1508_v38 = vpop.f32.mrb[8].mxu1 }
  0xf8   :  { %789 = vst.msk [vmem:[%s2359_s4 + $0x38] sm:$0xff] %vm67_vm0, %v1881_v33  ;;  %805 = vst.msk [vmem:[%s2359_s4 + $0xb8] sm:$0xff] %vm67_vm0, %v1883_v34  ;;  %v276_v39 = vadd.f32 %v1484_v37, %v1761_v45  ;;  %v356_v40 = vadd.f32 %v1508_v38, %v1761_v45  ;;  %v270_v41 = vpop.f32.mrb[9].mxu0  ;;  %v350_v42 = vpop.f32.mrb[9].mxu1 }
  0xf9   :  { %788 = vst.msk [vmem:[%s2359_s4 + $0x30] sm:$0xff] %vm67_vm0, %v1887_v35  ;;  %804 = vst.msk [vmem:[%s2359_s4 + $0xb0] sm:$0xff] %vm67_vm0, %v1889_v36  ;;  %v271_v46 = vadd.f32 %v1761_v45, %v270_v41  ;;  %v351_v47 = vadd.f32 %v1761_v45, %v350_v42 }
  0xfa   :  { %v1919_v48 = vmax.f32 %v276_v39, 0.0  ;;  %v1921_v49 = vmax.f32 %v356_v40, 0.0  ;;  %910 = vrot.lane.b32.xlu0 %v1350_v44, %s1569_s15  ;;  %v1352_v39 = vpack.c.bf16 %v1811_v7, %v1811_v7  ;;  %v1353_v40 = vpack.c.bf16 %v1805_v5, %v1805_v5 }
  0xfb   :  { %942 = vrot.lane.b32.xlu1 %v1366_v43, %s1569_s15  ;;  %v1925_v50 = vmax.f32 %v271_v46, 0.0  ;;  %v1927_v51 = vmax.f32 %v351_v47, 0.0  ;;  %v1487_v52 = vpop.f32.mrb[10].mxu0  ;;  %v1511_v53 = vpop.f32.mrb[10].mxu1 }
  0xfc   :  { %791 = vst.msk [vmem:[%s2359_s4 + $0x48] sm:$0xff] %vm67_vm0, %v1919_v48  ;;  %807 = vst.msk [vmem:[%s2359_s4 + $0xc8] sm:$0xff] %vm67_vm0, %v1921_v49  ;;  %v286_v59 = vadd.f32 %v1487_v52, %v1761_v45  ;;  %v366_v60 = vadd.f32 %v1511_v53, %v1761_v45  ;;  %v280_v61 = vpop.f32.mrb[11].mxu0  ;;  %v360_v62 = vpop.f32.mrb[11].mxu1  ;;  %v1369_v52 = vpack.c.bf16 %v1807_v6, %v1807_v6 }
  0xfd   :  { %790 = vst.msk [vmem:[%s2359_s4 + $0x40] sm:$0xff] %vm67_vm0, %v1925_v50  ;;  %806 = vst.msk [vmem:[%s2359_s4 + $0xc0] sm:$0xff] %vm67_vm0, %v1927_v51  ;;  %v281_v1 = vadd.f32 %v1761_v45, %v280_v61  ;;  %v361_v2 = vadd.f32 %v1761_v45, %v360_v62  ;;  %v434_v53 = vmul.f32 %v1767_v54, %v1849_v21 }
  0xfe   :  { %v1957_v3 = vmax.f32 %v286_v59, 0.0  ;;  %v1959_v4 = vmax.f32 %v366_v60, 0.0  ;;  %500 = vrot.lane.b32.xlu0 %v433_v0, %s1569_s15  ;;  %v435_v59 = vmul.f32 %v1767_v54, %v1843_v19  ;;  %v450_v60 = vmul.f32 %v1767_v54, %v1851_v22 }
  0xff   :  { %498 = vrot.lane.b32.xlu1 %v432_v63, %s1569_s15  ;;  %v1963_v9 = vmax.f32 %v281_v1, 0.0  ;;  %v1965_v10 = vmax.f32 %v361_v2, 0.0  ;;  %v1490_v11 = vpop.f32.mrb[12].mxu0  ;;  %v1514_v12 = vpop.f32.mrb[12].mxu1  ;;  %v451_v61 = vmul.f32 %v1767_v54, %v1845_v20  ;;  %v1354_v62 = vpack.c.bf16 %v1849_v21, %v1849_v21 }
 0x100   :  { %793 = vst.msk [vmem:[%s2359_s4 + $0x58] sm:$0xff] %vm67_vm0, %v1957_v3  ;;  %809 = vst.msk [vmem:[%s2359_s4 + $0xd8] sm:$0xff] %vm67_vm0, %v1959_v4  ;;  %v296_v13 = vadd.f32 %v1490_v11, %v1761_v45  ;;  %v376_v14 = vadd.f32 %v1514_v12, %v1761_v45  ;;  %v290_v15 = vpop.f32.mrb[13].mxu0  ;;  %v370_v16 = vpop.f32.mrb[13].mxu1  ;;  %v1355_v63 = vpack.c.bf16 %v1843_v19, %v1843_v19 }
 0x101   :  { %792 = vst.msk [vmem:[%s2359_s4 + $0x50] sm:$0xff] %vm67_vm0, %v1963_v9  ;;  %808 = vst.msk [vmem:[%s2359_s4 + $0xd0] sm:$0xff] %vm67_vm0, %v1965_v10  ;;  %v291_v23 = vadd.f32 %v1761_v45, %v290_v15  ;;  %v371_v24 = vadd.f32 %v1761_v45, %v370_v16  ;;  %v1370_v0 = vpack.c.bf16 %v1851_v22, %v1851_v22 }
 0x102   :  { %v1995_v25 = vmax.f32 %v296_v13, 0.0  ;;  %v1997_v26 = vmax.f32 %v376_v14, 0.0  ;;  %532 = vrot.lane.b32.xlu0 %v449_v18, %s1569_s15  ;;  %v1371_v1 = vpack.c.bf16 %v1845_v20, %v1845_v20  ;;  %v436_v2 = vmul.f32 %v1767_v54, %v1887_v35 }
 0x103   :  { %530 = vrot.lane.b32.xlu1 %v448_v17, %s1569_s15  ;;  %v2001_v27 = vmax.f32 %v291_v23, 0.0  ;;  %v2003_v28 = vmax.f32 %v371_v24, 0.0  ;;  %v1493_v29 = vpop.f32.mrb[14].mxu0  ;;  %v1517_v30 = vpop.f32.mrb[14].mxu1  ;;  %v437_v11 = vmul.f32 %v1767_v54, %v1881_v33  ;;  %v452_v12 = vmul.f32 %v1767_v54, %v1889_v36 }
 0x104   :  { %795 = vst.msk [vmem:[%s2359_s4 + $0x68] sm:$0xff] %vm67_vm0, %v1995_v25  ;;  %811 = vst.msk [vmem:[%s2359_s4 + $0xe8] sm:$0xff] %vm67_vm0, %v1997_v26  ;;  %v306_v31 = vadd.f32 %v1493_v29, %v1761_v45  ;;  %v386_v32 = vadd.f32 %v1517_v30, %v1761_v45  ;;  %v300_v37 = vpop.f32.mrb[15].mxu0  ;;  %v380_v38 = vpop.f32.mrb[15].mxu1  ;;  %v453_v13 = vmul.f32 %v1767_v54, %v1883_v34 }
 0x105   :  { %794 = vst.msk [vmem:[%s2359_s4 + $0x60] sm:$0xff] %vm67_vm0, %v2001_v27  ;;  %810 = vst.msk [vmem:[%s2359_s4 + $0xe0] sm:$0xff] %vm67_vm0, %v2003_v28  ;;  %v301_v41 = vadd.f32 %v1761_v45, %v300_v37  ;;  %v381_v42 = vadd.f32 %v1761_v45, %v380_v38  ;;  %v1368_v45 = vpack.c.bf16 %v1813_v8, %v1813_v8 }
 0x106   :  { %v2033_v43 = vmax.f32 %v306_v31, 0.0  ;;  %v2035_v44 = vmax.f32 %v386_v32, 0.0  ;;  %916 = vrot.lane.b32.xlu0 %v1353_v40, %s1569_s15  ;;  %v1356_v14 = vpack.c.bf16 %v1887_v35, %v1887_v35  ;;  %v1357_v15 = vpack.c.bf16 %v1881_v33, %v1881_v33 }
 0x107   :  { %914 = vrot.lane.b32.xlu1 %v1352_v39, %s1569_s15  ;;  %v2039_v46 = vmax.f32 %v301_v41, 0.0  ;;  %v2041_v47 = vmax.f32 %v381_v42, 0.0  ;;  %v1372_v16 = vpack.c.bf16 %v1889_v36, %v1889_v36  ;;  %v1373_v17 = vpack.c.bf16 %v1883_v34, %v1883_v34 }
 0x108   :  { %797 = vst.msk [vmem:[%s2359_s4 + $0x78] sm:$0xff] %vm67_vm0, %v2033_v43  ;;  %813 = vst.msk [vmem:[%s2359_s4 + $0xf8] sm:$0xff] %vm67_vm0, %v2035_v44  ;;  %v438_v18 = vmul.f32 %v1767_v54, %v1925_v50  ;;  %v439_v23 = vmul.f32 %v1767_v54, %v1919_v48  ;;  %v454_v24 = vmul.f32 %v1767_v54, %v1927_v51 }
 0x109   :  { %796 = vst.msk [vmem:[%s2359_s4 + $0x70] sm:$0xff] %vm67_vm0, %v2039_v46  ;;  %812 = vst.msk [vmem:[%s2359_s4 + $0xf0] sm:$0xff] %vm67_vm0, %v2041_v47  ;;  %v455_v29 = vmul.f32 %v1767_v54, %v1921_v49  ;;  %v1358_v30 = vpack.c.bf16 %v1925_v50, %v1925_v50  ;;  %v1359_v31 = vpack.c.bf16 %v1919_v48, %v1919_v48  ;;  %s1570_s4 = smov [#allocation2]  }
 0x10a   :  { %948 = vrot.lane.b32.xlu0 %v1369_v52, %s1569_s15  ;;  %v1374_v32 = vpack.c.bf16 %v1927_v51, %v1927_v51  ;;  %v1375_v37 = vpack.c.bf16 %v1921_v49, %v1921_v49  ;;  %v440_v38 = vmul.f32 %v1767_v54, %v1963_v9  ;;  %v441_v39 = vmul.f32 %v1767_v54, %v1957_v3  ;;  %s1239_s30 = sshll.u32 %s1570_s4, 4  ;;  %s1240_s30 = int_to_ptr.vmem [resolvable:$true] %s1239_s30 }
 0x10b   :  { %946 = vrot.lane.b32.xlu1 %v1368_v45, %s1569_s15  ;;  %v456_v40 = vmul.f32 %v1767_v54, %v1965_v10  ;;  %v457_v41 = vmul.f32 %v1767_v54, %v1959_v4  ;;  %v1360_v42 = vpack.c.bf16 %v1963_v9, %v1963_v9  ;;  %v1361_v45 = vpack.c.bf16 %v1957_v3, %v1957_v3  ;;  %s1545_s6 = scalar_lea.vmem %s1240_s30, 2048  ;;  %p1550_p1 = scmp.lt.s32.totalorder %s1240_s30, %s1240_s30 }
 0x10c   :  { %v1376_v52 = vpack.c.bf16 %v1965_v10, %v1965_v10  ;;  %p1546_p0 = scmp.ne.s32.totalorder %s1240_s30, %s1545_s6  ;;  %p1551_p2 = scmp.lt.s32.totalorder %s1545_s6, %s1545_s6 }
 0x10e   :  { %504 = vrot.lane.b32.xlu0 %v435_v59, %s1569_s15  ;;  %v442_v59 = vmul.f32 %v1767_v54, %v2001_v27  ;;  %p1552_p3 = por %p1551_p2, %p1550_p1 }
 0x10f   :  { %502 = vrot.lane.b32.xlu1 %v434_v53, %s1569_s15  ;;  %v1377_v53 = vpack.c.bf16 %v1959_v4, %v1959_v4 }
 0x110   :  { %p1553_p4 = pnand %p1552_p3, %p1546_p0 }
 0x112   :  { %536 = vrot.lane.b32.xlu0 %v451_v61, %s1569_s15  ;;  %v458_v61 = vmul.f32 %v1767_v54, %v2003_v28 }
 0x113   :  { %534 = vrot.lane.b32.xlu1 %v450_v60, %s1569_s15  ;;  %v443_v60 = vmul.f32 %v1767_v54, %v1995_v25 }
 0x116   :  { %920 = vrot.lane.b32.xlu0 %v1355_v63, %s1569_s15  ;;  %v1362_v63 = vpack.c.bf16 %v2001_v27, %v2001_v27 }
 0x117   :  { %918 = vrot.lane.b32.xlu1 %v1354_v62, %s1569_s15  ;;  %v459_v62 = vmul.f32 %v1767_v54, %v1997_v26 }
 0x11a   :  { %952 = vrot.lane.b32.xlu0 %v1371_v1, %s1569_s15  ;;  %v1378_v1 = vpack.c.bf16 %v2003_v28, %v2003_v28 }
 0x11b   :  { %950 = vrot.lane.b32.xlu1 %v1370_v0, %s1569_s15  ;;  %v1363_v0 = vpack.c.bf16 %v1995_v25, %v1995_v25 }
 0x11e   :  { %508 = vrot.lane.b32.xlu0 %v437_v11, %s1569_s15  ;;  %v444_v11 = vmul.f32 %v1767_v54, %v2039_v46 }
 0x11f   :  { %506 = vrot.lane.b32.xlu1 %v436_v2, %s1569_s15  ;;  %v1379_v2 = vpack.c.bf16 %v1997_v26, %v1997_v26 }
 0x122   :  { %540 = vrot.lane.b32.xlu0 %v453_v13, %s1569_s15 }
 0x123   :  { %538 = vrot.lane.b32.xlu1 %v452_v12, %s1569_s15  ;;  %v445_v12 = vmul.f32 %v1767_v54, %v2033_v43 }
 0x126   :  { %924 = vrot.lane.b32.xlu0 %v1357_v15, %s1569_s15  ;;  %v460_v15 = vmul.f32 %v1767_v54, %v2041_v47 }
 0x127   :  { %922 = vrot.lane.b32.xlu1 %v1356_v14, %s1569_s15 }
 0x12a   :  { %956 = vrot.lane.b32.xlu0 %v1373_v17, %s1569_s15 }
 0x12b   :  { %954 = vrot.lane.b32.xlu1 %v1372_v16, %s1569_s15  ;;  %v461_v16 = vmul.f32 %v1767_v54, %v2035_v44 }
 0x12e   :  { %512 = vrot.lane.b32.xlu0 %v439_v23, %s1569_s15  ;;  %v1364_v23 = vpack.c.bf16 %v2039_v46, %v2039_v46 }
 0x12f   :  { %510 = vrot.lane.b32.xlu1 %v438_v18, %s1569_s15 }
 0x132   :  { %544 = vrot.lane.b32.xlu0 %v455_v29, %s1569_s15 }
 0x133   :  { %542 = vrot.lane.b32.xlu1 %v454_v24, %s1569_s15  ;;  %v1365_v24 = vpack.c.bf16 %v2033_v43, %v2033_v43 }
 0x136   :  { %928 = vrot.lane.b32.xlu0 %v1359_v31, %s1569_s15 }
 0x137   :  { %926 = vrot.lane.b32.xlu1 %v1358_v30, %s1569_s15 }
 0x13a   :  { %960 = vrot.lane.b32.xlu0 %v1375_v37, %s1569_s15 }
 0x13b   :  { %958 = vrot.lane.b32.xlu1 %v1374_v32, %s1569_s15 }
 0x13e   :  { %516 = vrot.lane.b32.xlu0 %v441_v39, %s1569_s15 }
 0x13f   :  { %514 = vrot.lane.b32.xlu1 %v440_v38, %s1569_s15 }
 0x142   :  { %548 = vrot.lane.b32.xlu0 %v457_v41, %s1569_s15 }
 0x143   :  { %546 = vrot.lane.b32.xlu1 %v456_v40, %s1569_s15 }
 0x146   :  { %932 = vrot.lane.b32.xlu0 %v1361_v45, %s1569_s15 }
 0x147   :  { %930 = vrot.lane.b32.xlu1 %v1360_v42, %s1569_s15 }
 0x14a   :  { %964 = vrot.lane.b32.xlu0 %v1377_v53, %s1569_s15 }
 0x14b   :  { %962 = vrot.lane.b32.xlu1 %v1376_v52, %s1569_s15 }
 0x14e   :  { %520 = vrot.lane.b32.xlu0 %v443_v60, %s1569_s15 }
 0x14f   :  { %518 = vrot.lane.b32.xlu1 %v442_v59, %s1569_s15 }
 0x152   :  { %552 = vrot.lane.b32.xlu0 %v459_v62, %s1569_s15 }
 0x153   :  { %550 = vrot.lane.b32.xlu1 %v458_v61, %s1569_s15 }
 0x156   :  { %936 = vrot.lane.b32.xlu0 %v1363_v0, %s1569_s15 }
 0x157   :  { %934 = vrot.lane.b32.xlu1 %v1362_v63, %s1569_s15 }
 0x15a   :  { %968 = vrot.lane.b32.xlu0 %v1379_v2, %s1569_s15 }
 0x15b   :  { %966 = vrot.lane.b32.xlu1 %v1378_v1, %s1569_s15 }
 0x15e   :  { %524 = vrot.lane.b32.xlu0 %v445_v12, %s1569_s15 }
 0x15f   :  { %522 = vrot.lane.b32.xlu1 %v444_v11, %s1569_s15 }
 0x160   :  { %v529_v13 = vpop.permute.xlu0 %528 }
 0x161   :  { %v497_v14 = vpop.permute.xlu1 %496  ;;  %v641_v1 = vsel %vm67_vm0, %v529_v13, 0.0 }
 0x162   :  { %556 = vrot.lane.b32.xlu0 %v461_v16, %s1569_s15  ;;  %v593_v61 = vsel %vm67_vm0, %v497_v14, 0.0 }
 0x163   :  { %554 = vrot.lane.b32.xlu1 %v460_v15, %s1569_s15 }
 0x164   :  { %v945_v17 = vpop.permute.xlu0 %944 }
 0x165   :  { %v913_v18 = vpop.permute.xlu1 %912  ;;  %1024 = vst.msk [vmem:[#allocation2 + $0x44] sm:$0xf] %vm1006_vm1, %v945_v17 }
 0x166   :  { %1008 = vst.msk [vmem:[#allocation2 + $0x4] sm:$0xf] %vm1006_vm1, %v913_v18  ;;  %940 = vrot.lane.b32.xlu0 %v1365_v24, %s1569_s15 }
 0x167   :  { %938 = vrot.lane.b32.xlu1 %v1364_v23, %s1569_s15 }
 0x168   :  { %v495_v29 = vpop.permute.xlu0 %494 }
 0x169   :  { %v527_v54 = vpop.permute.xlu1 %526  ;;  %v590_v14 = vsel %vm67_vm0, %v495_v29, 0.0 }
 0x16a   :  { %v638_v0 = vsel %vm67_vm0, %v527_v54, 0.0 }
 0x16c   :  { %v911_v31 = vpop.permute.xlu0 %910 }
 0x16d   :  { %v943_v30 = vpop.permute.xlu1 %942  ;;  %1007 = vst.msk [vmem:[#allocation2] sm:$0xf] %vm1006_vm1, %v911_v31 }
 0x16e   :  { %1023 = vst.msk [vmem:[#allocation2 + $0x40] sm:$0xf] %vm1006_vm1, %v943_v30 }
 0x170   :  { %v501_v37 = vpop.permute.xlu0 %500 }
 0x171   :  { %v499_v32 = vpop.permute.xlu1 %498  ;;  %v599_v13 = vsel %vm67_vm0, %v501_v37, 0.0 }
 0x172   :  { %v596_v12 = vsel %vm67_vm0, %v499_v32, 0.0 }
 0x174   :  { %v533_v39 = vpop.permute.xlu0 %532 }
 0x175   :  { %v531_v38 = vpop.permute.xlu1 %530  ;;  %v647_v54 = vsel %vm67_vm0, %v533_v39, 0.0 }
 0x176   :  { %v644_v17 = vsel %vm67_vm0, %v531_v38, 0.0 }
 0x178   :  { %v917_v41 = vpop.permute.xlu0 %916 }
 0x179   :  { %v915_v40 = vpop.permute.xlu1 %914  ;;  %1010 = vst.msk [vmem:[#allocation2 + $0xc] sm:$0xf] %vm1006_vm1, %v917_v41 }
 0x17a   :  { %1009 = vst.msk [vmem:[#allocation2 + $0x8] sm:$0xf] %vm1006_vm1, %v915_v40 }
 0x17c   :  { %v949_v45 = vpop.permute.xlu0 %948 }
 0x17d   :  { %v947_v42 = vpop.permute.xlu1 %946  ;;  %1026 = vst.msk [vmem:[#allocation2 + $0x4c] sm:$0xf] %vm1006_vm1, %v949_v45 }
 0x17e   :  { %1025 = vst.msk [vmem:[#allocation2 + $0x48] sm:$0xf] %vm1006_vm1, %v947_v42 }
 0x180   :  { %v505_v53 = vpop.permute.xlu0 %504 }
 0x181   :  { %v503_v52 = vpop.permute.xlu1 %502  ;;  %v605_v32 = vsel %vm67_vm0, %v505_v53, 0.0 }
 0x182   :  { %v602_v24 = vsel %vm67_vm0, %v503_v52, 0.0 }
 0x184   :  { %v537_v60 = vpop.permute.xlu0 %536 }
 0x185   :  { %v535_v59 = vpop.permute.xlu1 %534  ;;  %594 = vadd.xlane.f32.xlu0 %v593_v61  ;;  %v653_v39 = vsel %vm67_vm0, %v537_v60, 0.0 }
 0x186   :  { %v650_v29 = vsel %vm67_vm0, %v535_v59, 0.0 }
 0x188   :  { %v921_v63 = vpop.permute.xlu0 %920 }
 0x189   :  { %v919_v62 = vpop.permute.xlu1 %918  ;;  %1012 = vst.msk [vmem:[#allocation2 + $0x14] sm:$0xf] %vm1006_vm1, %v921_v63  ;;  %639 = vadd.xlane.f32.xlu0 %v638_v0 }
 0x18a   :  { %1011 = vst.msk [vmem:[#allocation2 + $0x10] sm:$0xf] %vm1006_vm1, %v919_v62 }
 0x18b   :  { %642 = vadd.xlane.f32.xlu1 %v641_v1 }
 0x18c   :  { %v953_v11 = vpop.permute.xlu0 %952 }
 0x18d   :  { %v951_v2 = vpop.permute.xlu1 %950  ;;  %1028 = vst.msk [vmem:[#allocation2 + $0x54] sm:$0xf] %vm1006_vm1, %v953_v11  ;;  %597 = vadd.xlane.f32.xlu0 %v596_v12 }
 0x18e   :  { %1027 = vst.msk [vmem:[#allocation2 + $0x50] sm:$0xf] %vm1006_vm1, %v951_v2 }
 0x18f   :  { %591 = vadd.xlane.f32.xlu1 %v590_v14 }
 0x190   :  { %v509_v16 = vpop.permute.xlu0 %508 }
 0x191   :  { %v507_v15 = vpop.permute.xlu1 %506  ;;  %645 = vadd.xlane.f32.xlu0 %v644_v17  ;;  %v611_v52 = vsel %vm67_vm0, %v509_v16, 0.0 }
 0x192   :  { %v608_v40 = vsel %vm67_vm0, %v507_v15, 0.0 }
 0x193   :  { %600 = vadd.xlane.f32.xlu1 %v599_v13 }
 0x194   :  { %v541_v23 = vpop.permute.xlu0 %540 }
 0x195   :  { %v539_v18 = vpop.permute.xlu1 %538  ;;  %603 = vadd.xlane.f32.xlu0 %v602_v24  ;;  %v659_v62 = vsel %vm67_vm0, %v541_v23, 0.0 }
 0x196   :  { %v656_v45 = vsel %vm67_vm0, %v539_v18, 0.0 }
 0x197   :  { %648 = vadd.xlane.f32.xlu1 %v647_v54 }
 0x198   :  { %v925_v31 = vpop.permute.xlu0 %924 }
 0x199   :  { %v923_v30 = vpop.permute.xlu1 %922  ;;  %1014 = vst.msk [vmem:[#allocation2 + $0x1c] sm:$0xf] %vm1006_vm1, %v925_v31  ;;  %651 = vadd.xlane.f32.xlu0 %v650_v29 }
 0x19a   :  { %1013 = vst.msk [vmem:[#allocation2 + $0x18] sm:$0xf] %vm1006_vm1, %v923_v30 }
 0x19b   :  { %606 = vadd.xlane.f32.xlu1 %v605_v32 }
 0x19c   :  { %v957_v38 = vpop.permute.xlu0 %956 }
 0x19d   :  { %v955_v37 = vpop.permute.xlu1 %954  ;;  %1030 = vst.msk [vmem:[#allocation2 + $0x5c] sm:$0xf] %vm1006_vm1, %v957_v38  ;;  %609 = vadd.xlane.f32.xlu0 %v608_v40 }
 0x19e   :  { %1029 = vst.msk [vmem:[#allocation2 + $0x58] sm:$0xf] %vm1006_vm1, %v955_v37 }
 0x19f   :  { %654 = vadd.xlane.f32.xlu1 %v653_v39 }
 0x1a0   :  { %v513_v42 = vpop.permute.xlu0 %512 }
 0x1a1   :  { %v511_v41 = vpop.permute.xlu1 %510  ;;  %657 = vadd.xlane.f32.xlu0 %v656_v45  ;;  %v617_v1 = vsel %vm67_vm0, %v513_v42, 0.0 }
 0x1a2   :  { %v614_v61 = vsel %vm67_vm0, %v511_v41, 0.0 }
 0x1a3   :  { %612 = vadd.xlane.f32.xlu1 %v611_v52 }
 0x1a4   :  { %v545_v59 = vpop.permute.xlu0 %544 }
 0x1a5   :  { %v543_v53 = vpop.permute.xlu1 %542  ;;  %615 = vadd.xlane.f32.xlu0 %v614_v61  ;;  %v665_v12 = vsel %vm67_vm0, %v545_v59, 0.0 }
 0x1a6   :  { %v662_v60 = vsel %vm67_vm0, %v543_v53, 0.0 }
 0x1a7   :  { %660 = vadd.xlane.f32.xlu1 %v659_v62 }
 0x1a8   :  { %v929_v0 = vpop.permute.xlu0 %928 }
 0x1a9   :  { %v927_v63 = vpop.permute.xlu1 %926  ;;  %1016 = vst.msk [vmem:[#allocation2 + $0x24] sm:$0xf] %vm1006_vm1, %v929_v0  ;;  %663 = vadd.xlane.f32.xlu0 %v662_v60 }
 0x1aa   :  { %1015 = vst.msk [vmem:[#allocation2 + $0x20] sm:$0xf] %vm1006_vm1, %v927_v63 }
 0x1ab   :  { %618 = vadd.xlane.f32.xlu1 %v617_v1 }
 0x1ac   :  { %v961_v11 = vpop.permute.xlu0 %960 }
 0x1ad   :  { %v959_v2 = vpop.permute.xlu1 %958  ;;  %1032 = vst.msk [vmem:[#allocation2 + $0x64] sm:$0xf] %vm1006_vm1, %v961_v11 }
 0x1ae   :  { %1031 = vst.msk [vmem:[#allocation2 + $0x60] sm:$0xf] %vm1006_vm1, %v959_v2 }
 0x1af   :  { %666 = vadd.xlane.f32.xlu1 %v665_v12 }
 0x1b0   :  { %v517_v15 = vpop.permute.xlu0 %516 }
 0x1b1   :  { %v515_v14 = vpop.permute.xlu1 %514  ;;  %v623_v17 = vsel %vm67_vm0, %v517_v15, 0.0 }
 0x1b2   :  { %v620_v16 = vsel %vm67_vm0, %v515_v14, 0.0 }
 0x1b3   :  { %621 = vadd.xlane.f32.xlu0 %v620_v16  ;;  %624 = vadd.xlane.f32.xlu1 %v623_v17  ;;  %v1380_v16 = vpack.c.bf16 %v2041_v47, %v2041_v47  ;;  %v1381_v17 = vpack.c.bf16 %v2035_v44, %v2035_v44 }
 0x1b4   :  { %v549_v18 = vpop.permute.xlu0 %548 }
 0x1b5   :  { %v547_v13 = vpop.permute.xlu1 %546  ;;  %v671_v24 = vsel %vm67_vm0, %v549_v18, 0.0 }
 0x1b6   :  { %v668_v23 = vsel %vm67_vm0, %v547_v13, 0.0 }
 0x1b7   :  { %669 = vadd.xlane.f32.xlu0 %v668_v23  ;;  %672 = vadd.xlane.f32.xlu1 %v671_v24 }
 0x1b8   :  { %v933_v30 = vpop.permute.xlu0 %932 }
 0x1b9   :  { %v931_v54 = vpop.permute.xlu1 %930  ;;  %1018 = vst.msk [vmem:[#allocation2 + $0x2c] sm:$0xf] %vm1006_vm1, %v933_v30 }
 0x1ba   :  { %1017 = vst.msk [vmem:[#allocation2 + $0x28] sm:$0xf] %vm1006_vm1, %v931_v54 }
 0x1bc   :  { %v965_v29 = vpop.permute.xlu0 %964 }
 0x1bd   :  { %v963_v31 = vpop.permute.xlu1 %962  ;;  %1034 = vst.msk [vmem:[#allocation2 + $0x6c] sm:$0xf] %vm1006_vm1, %v965_v29 }
 0x1be   :  { %1033 = vst.msk [vmem:[#allocation2 + $0x68] sm:$0xf] %vm1006_vm1, %v963_v31 }
 0x1c0   :  { %v521_v37 = vpop.permute.xlu0 %520 }
 0x1c1   :  { %v519_v32 = vpop.permute.xlu1 %518  ;;  %v629_v40 = vsel %vm67_vm0, %v521_v37, 0.0 }
 0x1c2   :  { %v626_v38 = vsel %vm67_vm0, %v519_v32, 0.0  ;;  %630 = vadd.xlane.f32.xlu1 %v629_v40 }
 0x1c3   :  { %627 = vadd.xlane.f32.xlu0 %v626_v38 }
 0x1c4   :  { %v553_v41 = vpop.permute.xlu0 %552 }
 0x1c5   :  { %v551_v39 = vpop.permute.xlu1 %550  ;;  %v677_v45 = vsel %vm67_vm0, %v553_v41, 0.0 }
 0x1c6   :  { %v674_v42 = vsel %vm67_vm0, %v551_v39, 0.0  ;;  %678 = vadd.xlane.f32.xlu1 %v677_v45 }
 0x1c7   :  { %675 = vadd.xlane.f32.xlu0 %v674_v42 }
 0x1c8   :  { %v937_v53 = vpop.permute.xlu0 %936 }
 0x1c9   :  { %v935_v52 = vpop.permute.xlu1 %934  ;;  %1020 = vst.msk [vmem:[#allocation2 + $0x34] sm:$0xf] %vm1006_vm1, %v937_v53 }
 0x1ca   :  { %1019 = vst.msk [vmem:[#allocation2 + $0x30] sm:$0xf] %vm1006_vm1, %v935_v52 }
 0x1cc   :  { %v969_v61 = vpop.permute.xlu0 %968 }
 0x1cd   :  { %v967_v59 = vpop.permute.xlu1 %966  ;;  %1036 = vst.msk [vmem:[#allocation2 + $0x74] sm:$0xf] %vm1006_vm1, %v969_v61 }
 0x1ce   :  { %1035 = vst.msk [vmem:[#allocation2 + $0x70] sm:$0xf] %vm1006_vm1, %v967_v59 }
 0x1d0   :  { %v525_v63 = vpop.permute.xlu0 %524 }
 0x1d1   :  { %v523_v62 = vpop.permute.xlu1 %522  ;;  %v635_v60 = vsel %vm67_vm0, %v525_v63, 0.0 }
 0x1d2   :  { %v632_v0 = vsel %vm67_vm0, %v523_v62, 0.0  ;;  %636 = vadd.xlane.f32.xlu1 %v635_v60 }
 0x1d3   :  { %633 = vadd.xlane.f32.xlu0 %v632_v0 }
 0x1d4   :  { %v557_v2 = vpop.permute.xlu0 %556 }
 0x1d5   :  { %v555_v1 = vpop.permute.xlu1 %554  ;;  %v683_v12 = vsel %vm67_vm0, %v557_v2, 0.0 }
 0x1d6   :  { %v680_v11 = vsel %vm67_vm0, %v555_v1, 0.0  ;;  %684 = vadd.xlane.f32.xlu1 %v683_v12 }
 0x1d7   :  { %681 = vadd.xlane.f32.xlu0 %v680_v11 }
 0x1d8   :  { %v941_v15 = vpop.permute.xlu0 %940 }
 0x1d9   :  { %v939_v14 = vpop.permute.xlu1 %938  ;;  %1022 = vst.msk [vmem:[#allocation2 + $0x3c] sm:$0xf] %vm1006_vm1, %v941_v15 }
 0x1da   :  { %1021 = vst.msk [vmem:[#allocation2 + $0x38] sm:$0xf] %vm1006_vm1, %v939_v14 }
 0x1e7   :  { %970 = vrot.lane.b32.xlu1 %v1380_v16, %s1569_s15 }
 0x1ed   :  { %972 = vrot.lane.b32.xlu0 %v1381_v17, %s1569_s15 }
 0x212   :  { %v595_v13 = vpop.xlane.xlu0 %594 }
 0x213   :  { %vm687_vm2 = vcmp.ge.f32.partialorder %v595_v13, 0.0  ;;  %v719_v18 = vmul.f32 0.2, %v595_v13 }
 0x215   :  { %v751_v23 = vsel %vm687_vm2, %v595_v13, %v719_v18 }
 0x216   :  { %v1040_v24 = vmul.f32 %v751_v23, %v1769_v55  ;;  %v640_v54 = vpop.xlane.xlu0 %639 }
 0x217   :  { %vm702_vm4 = vcmp.ge.f32.partialorder %v640_v54, 0.0  ;;  %v734_v30 = vmul.f32 0.2, %v640_v54 }
 0x218   :  { %v643_v31 = vpop.xlane.xlu1 %642  ;;  %v1383_v29 = vpack.c.bf16 %v1040_v24, %v1040_v24 }
 0x219   :  { %vm703_vm5 = vcmp.ge.f32.partialorder %v643_v31, 0.0  ;;  %v735_v32 = vmul.f32 0.2, %v643_v31  ;;  %v766_v37 = vsel %vm702_vm4, %v640_v54, %v734_v30 }
 0x21a   :  { %1201 = vst.msk [vmem:[#allocation2 + $0x4] sm:$0xf] %vm1199_vm3, %v1383_v29  ;;  %v1055_v38 = vmul.f32 %v766_v37, %v1775_v58  ;;  %v598_v39 = vpop.xlane.xlu0 %597 }
 0x21b   :  { %v767_v40 = vsel %vm703_vm5, %v643_v31, %v735_v32  ;;  %vm688_vm6 = vcmp.ge.f32.partialorder %v598_v39, 0.0  ;;  %v720_v42 = vmul.f32 0.2, %v598_v39 }
 0x21c   :  { %v1056_v41 = vmul.f32 %v767_v40, %v1771_v56  ;;  %v592_v55 = vpop.xlane.xlu1 %591  ;;  %v1398_v45 = vpack.c.bf16 %v1055_v38, %v1055_v38 }
 0x21d   :  { %vm686_vm7 = vcmp.ge.f32.partialorder %v592_v55, 0.0  ;;  %v718_v52 = vmul.f32 0.2, %v592_v55  ;;  %v752_v59 = vsel %vm688_vm6, %v598_v39, %v720_v42 }
 0x21e   :  { %v1399_v53 = vpack.c.bf16 %v1056_v41, %v1056_v41  ;;  %1216 = vst.msk [vmem:[#allocation2 + $0x40] sm:$0xf] %vm1199_vm3, %v1398_v45  ;;  %v1041_v61 = vmul.f32 %v752_v59, %v1811_v7  ;;  %v646_v63 = vpop.xlane.xlu0 %645 }
 0x21f   :  { %v750_v62 = vsel %vm686_vm7, %v592_v55, %v718_v52  ;;  %vm704_vm8 = vcmp.ge.f32.partialorder %v646_v63, 0.0  ;;  %v736_v56 = vmul.f32 0.2, %v646_v63 }
 0x220   :  { %1217 = vst.msk [vmem:[#allocation2 + $0x44] sm:$0xf] %vm1199_vm3, %v1399_v53  ;;  %v1039_v58 = vmul.f32 %v750_v62, %v1773_v57  ;;  %v601_v0 = vpop.xlane.xlu1 %600  ;;  %v1384_v60 = vpack.c.bf16 %v1041_v61, %v1041_v61 }
 0x221   :  { %vm689_vm9 = vcmp.ge.f32.partialorder %v601_v0, 0.0  ;;  %v721_v1 = vmul.f32 0.2, %v601_v0  ;;  %v768_v11 = vsel %vm704_vm8, %v646_v63, %v736_v56 }
 0x222   :  { %v1382_v2 = vpack.c.bf16 %v1039_v58, %v1039_v58  ;;  %1202 = vst.msk [vmem:[#allocation2 + $0x8] sm:$0xf] %vm1199_vm3, %v1384_v60  ;;  %v1057_v12 = vmul.f32 %v768_v11, %v1813_v8  ;;  %v604_v7 = vpop.xlane.xlu0 %603 }
 0x223   :  { %v753_v14 = vsel %vm689_vm9, %v601_v0, %v721_v1  ;;  %vm690_vm10 = vcmp.ge.f32.partialorder %v604_v7, 0.0  ;;  %v722_v57 = vmul.f32 0.2, %v604_v7 }
 0x224   :  { %1200 = vst.msk [vmem:[#allocation2] sm:$0xf] %vm1199_vm3, %v1382_v2  ;;  %v1042_v15 = vmul.f32 %v753_v14, %v1805_v5  ;;  %v649_v16 = vpop.xlane.xlu1 %648  ;;  %v1400_v17 = vpack.c.bf16 %v1057_v12, %v1057_v12 }
 0x225   :  { %vm705_vm11 = vcmp.ge.f32.partialorder %v649_v16, 0.0  ;;  %v737_v13 = vmul.f32 0.2, %v649_v16  ;;  %v754_v23 = vsel %vm690_vm10, %v604_v7, %v722_v57 }
 0x226   :  { %v1385_v18 = vpack.c.bf16 %v1042_v15, %v1042_v15  ;;  %1218 = vst.msk [vmem:[#allocation2 + $0x48] sm:$0xf] %vm1199_vm3, %v1400_v17  ;;  %v1043_v24 = vmul.f32 %v754_v23, %v1849_v21  ;;  %v652_v8 = vpop.xlane.xlu0 %651 }
 0x227   :  { %v769_v54 = vsel %vm705_vm11, %v649_v16, %v737_v13  ;;  %vm706_vm12 = vcmp.ge.f32.partialorder %v652_v8, 0.0  ;;  %v738_v5 = vmul.f32 0.2, %v652_v8 }
 0x228   :  { %1203 = vst.msk [vmem:[#allocation2 + $0xc] sm:$0xf] %vm1199_vm3, %v1385_v18  ;;  %v1058_v30 = vmul.f32 %v769_v54, %v1807_v6  ;;  %v607_v31 = vpop.xlane.xlu1 %606  ;;  %v1386_v29 = vpack.c.bf16 %v1043_v24, %v1043_v24 }
 0x229   :  { %vm691_vm13 = vcmp.ge.f32.partialorder %v607_v31, 0.0  ;;  %v723_v32 = vmul.f32 0.2, %v607_v31  ;;  %v770_v38 = vsel %vm706_vm12, %v652_v8, %v738_v5 }
 0x22a   :  { %v1401_v37 = vpack.c.bf16 %v1058_v30, %v1058_v30  ;;  %1204 = vst.msk [vmem:[#allocation2 + $0x10] sm:$0xf] %vm1199_vm3, %v1386_v29  ;;  %v1059_v40 = vmul.f32 %v770_v38, %v1851_v22  ;;  %v610_v21 = vpop.xlane.xlu0 %609 }
 0x22b   :  { %v755_v39 = vsel %vm691_vm13, %v607_v31, %v723_v32  ;;  %vm692_vm14 = vcmp.ge.f32.partialorder %v610_v21, 0.0  ;;  %v724_v6 = vmul.f32 0.2, %v610_v21 }
 0x22c   :  { %1219 = vst.msk [vmem:[#allocation2 + $0x4c] sm:$0xf] %vm1199_vm3, %v1401_v37  ;;  %v1044_v41 = vmul.f32 %v755_v39, %v1843_v19  ;;  %v655_v42 = vpop.xlane.xlu1 %654  ;;  %v1402_v55 = vpack.c.bf16 %v1059_v40, %v1059_v40 }
 0x22d   :  { %vm707_vm15 = vcmp.ge.f32.partialorder %v655_v42, 0.0  ;;  %v739_v45 = vmul.f32 0.2, %v655_v42  ;;  %v756_v53 = vsel %vm692_vm14, %v610_v21, %v724_v6 }
 0x22e   :  { %v1387_v52 = vpack.c.bf16 %v1044_v41, %v1044_v41  ;;  %1220 = vst.msk [vmem:[#allocation2 + $0x50] sm:$0xf] %vm1199_vm3, %v1402_v55  ;;  %v1045_v59 = vmul.f32 %v756_v53, %v1887_v35  ;;  %v658_v22 = vpop.xlane.xlu0 %657 }
 0x22f   :  { %v771_v61 = vsel %vm707_vm15, %v655_v42, %v739_v45  ;;  %vm708_vm0 = vcmp.ge.f32.partialorder %v658_v22, 0.0  ;;  %v740_v19 = vmul.f32 0.2, %v658_v22 }
 0x230   :  { %1205 = vst.msk [vmem:[#allocation2 + $0x14] sm:$0xf] %vm1199_vm3, %v1387_v52  ;;  %v1060_v62 = vmul.f32 %v771_v61, %v1845_v20  ;;  %v613_v63 = vpop.xlane.xlu1 %612  ;;  %v1388_v58 = vpack.c.bf16 %v1045_v59, %v1045_v59 }
 0x231   :  { %vm693_vm2 = vcmp.ge.f32.partialorder %v613_v63, 0.0  ;;  %v725_v56 = vmul.f32 0.2, %v613_v63  ;;  %v772_v60 = vsel %vm708_vm0, %v658_v22, %v740_v19 }
 0x232   :  { %v1403_v0 = vpack.c.bf16 %v1060_v62, %v1060_v62  ;;  %1206 = vst.msk [vmem:[#allocation2 + $0x18] sm:$0xf] %vm1199_vm3, %v1388_v58  ;;  %v1061_v1 = vmul.f32 %v772_v60, %v1889_v36  ;;  %v616_v35 = vpop.xlane.xlu0 %615 }
 0x233   :  { %v757_v2 = vsel %vm693_vm2, %v613_v63, %v725_v56  ;;  %vm694_vm4 = vcmp.ge.f32.partialorder %v616_v35, 0.0  ;;  %v726_v20 = vmul.f32 0.2, %v616_v35 }
 0x234   :  { %1221 = vst.msk [vmem:[#allocation2 + $0x54] sm:$0xf] %vm1199_vm3, %v1403_v0  ;;  %v1046_v11 = vmul.f32 %v757_v2, %v1881_v33  ;;  %v661_v12 = vpop.xlane.xlu1 %660  ;;  %v1404_v14 = vpack.c.bf16 %v1061_v1, %v1061_v1 }
 0x235   :  { %vm709_vm5 = vcmp.ge.f32.partialorder %v661_v12, 0.0  ;;  %v741_v7 = vmul.f32 0.2, %v661_v12  ;;  %v758_v57 = vsel %vm694_vm4, %v616_v35, %v726_v20 }
 0x236   :  { %v1389_v15 = vpack.c.bf16 %v1046_v11, %v1046_v11  ;;  %1222 = vst.msk [vmem:[#allocation2 + $0x58] sm:$0xf] %vm1199_vm3, %v1404_v14  ;;  %v1047_v16 = vmul.f32 %v758_v57, %v1925_v50  ;;  %v664_v36 = vpop.xlane.xlu0 %663 }
 0x237   :  { %v773_v17 = vsel %vm709_vm5, %v661_v12, %v741_v7  ;;  %vm710_vm6 = vcmp.ge.f32.partialorder %v664_v36, 0.0  ;;  %v742_v33 = vmul.f32 0.2, %v664_v36 }
 0x238   :  { %1207 = vst.msk [vmem:[#allocation2 + $0x1c] sm:$0xf] %vm1199_vm3, %v1389_v15  ;;  %v1062_v13 = vmul.f32 %v773_v17, %v1883_v34  ;;  %v619_v18 = vpop.xlane.xlu1 %618  ;;  %v1390_v23 = vpack.c.bf16 %v1047_v16, %v1047_v16 }
 0x239   :  { %vm695_vm7 = vcmp.ge.f32.partialorder %v619_v18, 0.0  ;;  %v727_v24 = vmul.f32 0.2, %v619_v18  ;;  %v774_v8 = vsel %vm710_vm6, %v664_v36, %v742_v33 }
 0x23a   :  { %v1405_v54 = vpack.c.bf16 %v1062_v13, %v1062_v13  ;;  %1208 = vst.msk [vmem:[#allocation2 + $0x20] sm:$0xf] %vm1199_vm3, %v1390_v23  ;;  %v1063_v30 = vmul.f32 %v774_v8, %v1927_v51 }
 0x23b   :  { %v759_v5 = vsel %vm695_vm7, %v619_v18, %v727_v24 }
 0x23c   :  { %1223 = vst.msk [vmem:[#allocation2 + $0x5c] sm:$0xf] %vm1199_vm3, %v1405_v54  ;;  %v1048_v50 = vmul.f32 %v759_v5, %v1919_v48  ;;  %v667_v31 = vpop.xlane.xlu1 %666  ;;  %v1406_v29 = vpack.c.bf16 %v1063_v30, %v1063_v30 }
 0x23d   :  { %vm711_vm8 = vcmp.ge.f32.partialorder %v667_v31, 0.0  ;;  %v743_v34 = vmul.f32 0.2, %v667_v31 }
 0x23e   :  { %v1391_v32 = vpack.c.bf16 %v1048_v50, %v1048_v50  ;;  %1224 = vst.msk [vmem:[#allocation2 + $0x60] sm:$0xf] %vm1199_vm3, %v1406_v29 }
 0x23f   :  { %v775_v37 = vsel %vm711_vm8, %v667_v31, %v743_v34 }
 0x240   :  { %1209 = vst.msk [vmem:[#allocation2 + $0x24] sm:$0xf] %vm1199_vm3, %v1391_v32  ;;  %v1064_v38 = vmul.f32 %v775_v37, %v1921_v49  ;;  %v625_v40 = vpop.xlane.xlu1 %624  ;;  %v622_v39 = vpop.xlane.xlu0 %621 }
 0x241   :  { %vm697_vm9 = vcmp.ge.f32.partialorder %v625_v40, 0.0  ;;  %v729_v51 = vmul.f32 0.2, %v625_v40  ;;  %vm696_vm10 = vcmp.ge.f32.partialorder %v622_v39, 0.0  ;;  %v728_v21 = vmul.f32 0.2, %v622_v39 }
 0x242   :  { %v1407_v41 = vpack.c.bf16 %v1064_v38, %v1064_v38 }
 0x243   :  { %v761_v48 = vsel %vm697_vm9, %v625_v40, %v729_v51  ;;  %v760_v6 = vsel %vm696_vm10, %v622_v39, %v728_v21 }
 0x244   :  { %1225 = vst.msk [vmem:[#allocation2 + $0x64] sm:$0xf] %vm1199_vm3, %v1407_v41  ;;  %v1050_v42 = vmul.f32 %v761_v48, %v1957_v3  ;;  %v1049_v55 = vmul.f32 %v760_v6, %v1963_v9  ;;  %v673_v45 = vpop.xlane.xlu1 %672  ;;  %v670_v52 = vpop.xlane.xlu0 %669 }
 0x245   :  { %vm713_vm11 = vcmp.ge.f32.partialorder %v673_v45, 0.0  ;;  %v745_v53 = vmul.f32 0.2, %v673_v45  ;;  %vm712_vm12 = vcmp.ge.f32.partialorder %v670_v52, 0.0  ;;  %v744_v49 = vmul.f32 0.2, %v670_v52 }
 0x246   :  { %v1393_v59 = vpack.c.bf16 %v1050_v42, %v1050_v42  ;;  %v1392_v61 = vpack.c.bf16 %v1049_v55, %v1049_v55 }
 0x247   :  { %v777_v22 = vsel %vm713_vm11, %v673_v45, %v745_v53  ;;  %v776_v62 = vsel %vm712_vm12, %v670_v52, %v744_v49 }
 0x248   :  { %1211 = vst.msk [vmem:[#allocation2 + $0x2c] sm:$0xf] %vm1199_vm3, %v1393_v59  ;;  %1210 = vst.msk [vmem:[#allocation2 + $0x28] sm:$0xf] %vm1199_vm3, %v1392_v61  ;;  %v1066_v19 = vmul.f32 %v777_v22, %v1959_v4  ;;  %v1065_v3 = vmul.f32 %v776_v62, %v1965_v10 }
 0x24a   :  { %v1409_v63 = vpack.c.bf16 %v1066_v19, %v1066_v19  ;;  %v1408_v9 = vpack.c.bf16 %v1065_v3, %v1065_v3 }
 0x24c   :  { %1227 = vst.msk [vmem:[#allocation2 + $0x6c] sm:$0xf] %vm1199_vm3, %v1409_v63  ;;  %1226 = vst.msk [vmem:[#allocation2 + $0x68] sm:$0xf] %vm1199_vm3, %v1408_v9 }
 0x24f   :  { %v631_v58 = vpop.xlane.xlu1 %630 }
 0x250   :  { %v628_v56 = vpop.xlane.xlu0 %627  ;;  %vm699_vm13 = vcmp.ge.f32.partialorder %v631_v58, 0.0  ;;  %v731_v0 = vmul.f32 0.2, %v631_v58 }
 0x251   :  { %vm698_vm14 = vcmp.ge.f32.partialorder %v628_v56, 0.0  ;;  %v730_v60 = vmul.f32 0.2, %v628_v56 }
 0x252   :  { %v763_v1 = vsel %vm699_vm13, %v631_v58, %v731_v0 }
 0x253   :  { %v762_v2 = vsel %vm698_vm14, %v628_v56, %v730_v60  ;;  %v1052_v35 = vmul.f32 %v763_v1, %v1995_v25  ;;  %v679_v11 = vpop.xlane.xlu1 %678 }
 0x254   :  { %v1051_v4 = vmul.f32 %v762_v2, %v2001_v27  ;;  %v676_v10 = vpop.xlane.xlu0 %675  ;;  %vm715_vm15 = vcmp.ge.f32.partialorder %v679_v11, 0.0  ;;  %v747_v20 = vmul.f32 0.2, %v679_v11 }
 0x255   :  { %vm714_vm0 = vcmp.ge.f32.partialorder %v676_v10, 0.0  ;;  %v746_v12 = vmul.f32 0.2, %v676_v10  ;;  %v1395_v14 = vpack.c.bf16 %v1052_v35, %v1052_v35 }
 0x256   :  { %v1394_v7 = vpack.c.bf16 %v1051_v4, %v1051_v4  ;;  %v779_v15 = vsel %vm715_vm15, %v679_v11, %v747_v20 }
 0x257   :  { %v778_v57 = vsel %vm714_vm0, %v676_v10, %v746_v12  ;;  %1213 = vst.msk [vmem:[#allocation2 + $0x34] sm:$0xf] %vm1199_vm3, %v1395_v14  ;;  %v1068_v16 = vmul.f32 %v779_v15, %v1997_v26 }
 0x258   :  { %1212 = vst.msk [vmem:[#allocation2 + $0x30] sm:$0xf] %vm1199_vm3, %v1394_v7  ;;  %v1067_v25 = vmul.f32 %v778_v57, %v2003_v28 }
 0x259   :  { %v1411_v17 = vpack.c.bf16 %v1068_v16, %v1068_v16 }
 0x25a   :  { %v1410_v27 = vpack.c.bf16 %v1067_v25, %v1067_v25 }
 0x25b   :  { %1229 = vst.msk [vmem:[#allocation2 + $0x74] sm:$0xf] %vm1199_vm3, %v1411_v17 }
 0x25c   :  { %1228 = vst.msk [vmem:[#allocation2 + $0x70] sm:$0xf] %vm1199_vm3, %v1410_v27 }
 0x25f   :  { %v637_v36 = vpop.xlane.xlu1 %636 }
 0x260   :  { %v634_v13 = vpop.xlane.xlu0 %633  ;;  %vm701_vm2 = vcmp.ge.f32.partialorder %v637_v36, 0.0  ;;  %v733_v33 = vmul.f32 0.2, %v637_v36 }
 0x261   :  { %vm700_vm4 = vcmp.ge.f32.partialorder %v634_v13, 0.0  ;;  %v732_v18 = vmul.f32 0.2, %v634_v13 }
 0x262   :  { %v765_v23 = vsel %vm701_vm2, %v637_v36, %v733_v33 }
 0x263   :  { %v764_v24 = vsel %vm700_vm4, %v634_v13, %v732_v18  ;;  %v1054_v54 = vmul.f32 %v765_v23, %v2033_v43  ;;  %v685_v8 = vpop.xlane.xlu1 %684 }
 0x264   :  { %v1053_v26 = vmul.f32 %v764_v24, %v2039_v46  ;;  %v682_v28 = vpop.xlane.xlu0 %681  ;;  %vm717_vm5 = vcmp.ge.f32.partialorder %v685_v8, 0.0  ;;  %v749_v30 = vmul.f32 0.2, %v685_v8 }
 0x265   :  { %vm716_vm6 = vcmp.ge.f32.partialorder %v682_v28, 0.0  ;;  %v748_v5 = vmul.f32 0.2, %v682_v28  ;;  %v1397_v50 = vpack.c.bf16 %v1054_v54, %v1054_v54 }
 0x266   :  { %v1396_v31 = vpack.c.bf16 %v1053_v26, %v1053_v26  ;;  %v781_v29 = vsel %vm717_vm5, %v685_v8, %v749_v30 }
 0x267   :  { %v780_v34 = vsel %vm716_vm6, %v682_v28, %v748_v5  ;;  %1215 = vst.msk [vmem:[#allocation2 + $0x3c] sm:$0xf] %vm1199_vm3, %v1397_v50  ;;  %v1070_v43 = vmul.f32 %v781_v29, %v2035_v44  ;;  %v971_v32 = vpop.permute.xlu1 %970 }
 0x268   :  { %1214 = vst.msk [vmem:[#allocation2 + $0x38] sm:$0xf] %vm1199_vm3, %v1396_v31  ;;  %v1069_v46 = vmul.f32 %v780_v34, %v2041_v47  ;;  %v973_v37 = vpop.permute.xlu0 %972 }
 0x269   :  { %1037 = vst.msk [vmem:[#allocation2 + $0x78] sm:$0xf] %vm1006_vm1, %v971_v32  ;;  %1038 = vst.msk [vmem:[#allocation2 + $0x7c] sm:$0xf] %vm1006_vm1, %v973_v37  ;;  %v1413_v38 = vpack.c.bf16 %v1070_v43, %v1070_v43 }
 0x26a   :  { %v1412_v40 = vpack.c.bf16 %v1069_v46, %v1069_v46 }
 0x26b   :  { %1231 = vst.msk [vmem:[#allocation2 + $0x7c] sm:$0xf] %vm1199_vm3, %v1413_v38 }
 0x26c   :  { %1230 = vst.msk [vmem:[#allocation2 + $0x78] sm:$0xf] %vm1199_vm3, %v1412_v40 }
 0x26d   :  { %1556 = shalt.err (!%p1553_p4)
}
 0x26e   :  { %s1557_s9 = scalar_lea.hbm %s2360_s5, 2048 }
 0x26f   :  { %p1558_p5 = scmp.ne.s32.totalorder %s2360_s5, %s1557_s9  ;;  %p1561_p6 = scmp.lt.u32.totalorder %s1557_s9, %s2360_s5 }
 0x271   :  { %p1563_p7 = pnand %p1561_p6, %p1558_p5 }
 0x273   :  { %1566 = shalt.err (!%p1563_p7)
}
 0x274   :  { %s1571_s14 = smov 4  }
 0x275   :  { %1245 = dma.vmem_to_hbm [thread:$0]  %s1240_s30, 2048, %s2360_s5, [#allocation3], %s1569_s15, %s1569_s15, %s1571_s14  }
 0x276   :  { %1567 = dma.done.wait [#allocation3], 2048  }
 0x277   :  { %1568 = vsyncadd [#allocation3], 4294965248 }
 0x278   :  { %1251 = vsyncpa [#allocation3], 1 }

</bundles_post_ra>
